<compile_context>
chip_gen: v5e
topology: v5e:2x2
jax: 0.10.0
libtpu: 0.0.40
codegen_flags: <defaults>
</compile_context>

<pallas_src>
import functools

import jax
import jax.numpy as jnp
from jax.experimental import pallas as pl
from jax.experimental.pallas import tpu as pltpu


# ----------------------------------------------------------------------------
# Fused kernel: [embedding Linear incl. folded time-embed] -> (identity
# encoder) -> segment pooling -> SiLU/Linear MLP -> contrastive loss,
# gridded over node blocks with a resident VMEM accumulator.
# ----------------------------------------------------------------------------
def ifencoder_fused_kernel(h_ref, gid_ref,
                           we_ref, be_ref, isn_ref,
                           w1_ref, b1_ref, w2_ref, b2_ref,
                           out_ref, posd_ref, negd_ref, loss_ref,
                           acc_ref,
                           *, n_real_graphs, neg_thresh):
    k = pl.program_id(0)

    @pl.when(k == 0)
    def _():
        acc_ref[...] = jnp.zeros_like(acc_ref)

    # ---- embedding Linear; beta/sin/cos ride as extra K columns (MXU) ------
    h = h_ref[...]                                            # [rows, ek] bf16
    emb = jnp.dot(h, we_ref[...],
                  preferred_element_type=jnp.float32) + be_ref[...]   # [rows, Hd] f32

    # TODO(synk): EPT/AMEGNN graph encoder (uses Z, edges) is an external
    # checkpointed module; treated as identity on node features here.

    # ---- std_conserve_scatter_sum partial: transposed onehot @ emb ---------
    gid = gid_ref[...]                                        # [1, rows] int32
    g_slots = acc_ref.shape[0]
    rows = h.shape[0]
    giota = jax.lax.broadcasted_iota(jnp.int32, (g_slots, rows), 0)
    # padded node rows carry gid = -1 -> match nothing -> contribute 0.
    # onehot is exact in bf16 (values are 0/1); emb bf16 + f32 accumulation.
    onehot_t = (giota == gid).astype(jnp.float32).astype(jnp.bfloat16)  # [G, rows]
    acc_ref[...] += jnp.dot(onehot_t, emb.astype(jnp.bfloat16),
                            preferred_element_type=jnp.float32)         # [G, Hd]

    # ---- finalize on the last node block ------------------------------------
    @pl.when(k == pl.num_programs(0) - 1)
    def _():
        pooled = acc_ref[...] * isn_ref[...]                  # scale by 1/sqrt(n_g)
        x = pooled * jax.nn.sigmoid(pooled)                   # SiLU (f32, EUP)
        x = jnp.dot(x.astype(jnp.bfloat16), w1_ref[...],
                    preferred_element_type=jnp.float32) + b1_ref[...]
        x = x * jax.nn.sigmoid(x)                             # SiLU (f32)
        out = jnp.dot(x.astype(jnp.bfloat16), w2_ref[...],
                      preferred_element_type=jnp.float32) + b2_ref[...]
        out_ref[...] = out                                    # [3*B_pad, Op] lane-dense

        # contrastive loss: graphs laid out [ref | pos | neg], B_pad rows each
        bp = posd_ref.shape[0]
        r_e = out[0 * bp:1 * bp, :]
        p_e = out[1 * bp:2 * bp, :]
        n_e = out[2 * bp:3 * bp, :]
        dp = r_e - p_e
        dn = r_e - n_e
        # padded output lanes are exactly zero (zero-padded W2 AND b2) -> sums exact
        pd = jnp.sqrt(jnp.sum(dp * dp, axis=-1, keepdims=True))   # [B_pad, 1]
        nd = jnp.sqrt(jnp.sum(dn * dn, axis=-1, keepdims=True))
        posd_ref[...] = pd
        negd_ref[...] = nd

        valid = (jax.lax.broadcasted_iota(jnp.int32, (bp, 1), 0)
                 < n_real_graphs).astype(jnp.float32)             # mask padded graphs
        hinge = jnp.maximum(neg_thresh - nd, 0.0)
        inv_b = 1.0 / float(n_real_graphs)
        loss_ref[...] = (jnp.sum(pd * valid, axis=0, keepdims=True)
                         + jnp.sum(hinge * valid, axis=0, keepdims=True)) * inv_b


def _round_up(x, m):
    return (x + m - 1) // m * m


def ifencoder_forward(subsets, params, batch_size, embed_size, hidden_size,
                      out_size, neg_thresh, block_rows=512):
    """Fused IFEncoder.forward hot path.

    subsets: list of 3 tuples (H [Ns, E] f32, beta [Ns] f32, bid [Ns] int32)
             for the ref / pos / neg encodes.
    Returns (ref_H, pos_H, neg_H, pos_dist, neg_dist, loss).
    """
    lane = 128
    ek_real = embed_size + 3                       # H feats + beta,sin,cos columns
    ek = _round_up(ek_real, 8)                     # narrow HBM width (NOT 128)
    hd = _round_up(hidden_size, lane)
    op = _round_up(out_size, lane)
    b_pad = _round_up(max(batch_size, 8), 8)
    n_sub = len(subsets)                           # 3: ref / pos / neg
    n_graph_slots = n_sub * b_pad

    # ---- build the batched node stream (ref|pos|neg) once, narrow + bf16 ----
    feat_list, gid_list = [], []
    for s, (H, beta, bid) in enumerate(subsets):
        t_embed = jnp.stack([beta, jnp.sin(beta), jnp.cos(beta)], axis=-1)  # [Ns,3]
        feat_list.append(jnp.concatenate([H, t_embed], axis=-1))            # [Ns,E+3]
        gid_list.append(bid.astype(jnp.int32) + s * b_pad)   # offset graph ids per subset
    feat_all = jnp.concatenate(feat_list, axis=0)            # [N, E+3] f32
    gid_all = jnp.concatenate(gid_list, axis=0)
    n_tot = feat_all.shape[0]

    # block_rows: multiple of 16 (bf16 sublanes); clamp for tiny inputs.
    block_rows = max(16, min(int(block_rows), _round_up(n_tot, 16)))
    n_pad = _round_up(n_tot, block_rows)
    if not (block_rows % lane == 0 or n_pad == block_rows):
        raise ValueError("block_rows must be a multiple of 128 when the node "
                         "stream spans multiple blocks (lane-dense gid tile).")

    # single HBM materialization of the node stream (narrow, already bf16)
    H_bf = (jnp.zeros((n_pad, ek), jnp.bfloat16)
            .at[:n_tot, :ek_real].set(feat_all.astype(jnp.bfloat16)))
    # gid as a lane-dense row vector [1, n_pad]; padded columns = -1
    gid_p = jnp.full((1, n_pad), -1, jnp.int32).at[0, :n_tot].set(gid_all)

    # per-graph 1/sqrt(n): pure index bookkeeping (guards empty graphs -> no NaN)
    counts = jnp.zeros((n_graph_slots,), jnp.float32).at[gid_all].add(1.0)
    inv_sqrt_n = (1.0 / jnp.sqrt(jnp.maximum(counts, 1.0)))[:, None]   # [G, 1]

    # ---- pad weights to lane-dense shapes; MXU operands in bf16 -------------
    def pad2(w, r, c):
        return jnp.zeros((r, c), jnp.float32).at[:w.shape[0], :w.shape[1]].set(w)

    W_emb = pad2(params["W_emb"], ek, hd).astype(jnp.bfloat16)  # rows: [H | beta | sin | cos | 0]
    b_emb = pad2(params["b_emb"], 1, hd)
    W1 = pad2(params["W1"], hd, hd).astype(jnp.bfloat16)
    b1 = pad2(params["b1"], 1, hd)
    W2 = pad2(params["W2"], hd, op).astype(jnp.bfloat16)        # zero pad keeps out lanes exact 0
    b2 = pad2(params["b2"], 1, op)

    num_blocks = n_pad // block_rows
    kern = functools.partial(ifencoder_fused_kernel,
                             n_real_graphs=int(batch_size),
                             neg_thresh=float(neg_thresh))

    def full(shape):
        # grid-invariant block (fetched once).
        # TODO(synk): pipeline_mode=pl.Buffered(1) would halve their VMEM; not
        # needed at these sizes.
        return pl.BlockSpec(shape, lambda k: (0, 0))

    grid_spec = pltpu.PrefetchScalarGridSpec(
        num_scalar_prefetch=0,
        grid=(num_blocks,),
        in_specs=[
            pl.BlockSpec((block_rows, ek), lambda k: (k, 0)),   # H (bf16, narrow)
            pl.BlockSpec((1, block_rows), lambda k: (0, k)),    # graph ids (lane-dense row)
            full((ek, hd)),                                     # W_emb (incl. time rows)
            full((1, hd)),                                      # b_emb
            full((n_graph_slots, 1)),                           # 1/sqrt(n_g)
            full((hd, hd)), full((1, hd)),                      # W1, b1
            full((hd, op)), full((1, op)),                      # W2, b2
        ],
        out_specs=(
            full((n_graph_slots, op)),                          # graph embeddings
            full((b_pad, 1)),                                   # pos_dist
            full((b_pad, 1)),                                   # neg_dist
            full((1, 1)),                                       # loss
        ),
        scratch_shapes=[pltpu.VMEM((n_graph_slots, hd), jnp.float32)],  # pooled acc
    )

    out, pd, nd, loss = pl.pallas_call(
        kern,
        out_shape=(jax.ShapeDtypeStruct((n_graph_slots, op), jnp.float32),
                   jax.ShapeDtypeStruct((b_pad, 1), jnp.float32),
                   jax.ShapeDtypeStruct((b_pad, 1), jnp.float32),
                   jax.ShapeDtypeStruct((1, 1), jnp.float32)),
        grid_spec=grid_spec,
        compiler_params=pltpu.CompilerParams(
            # node axis is a reduction into acc_ref -> "arbitrary".
            # TODO(synk): v7x second TensorCore: add a leading "parallel" axis
            # over disjoint graph partitions; requires a cross-core reduce
            # before the contrastive finalize, skipped at this scale.
            # TODO(synk): at real scale (thousands of graph slots) bound
            # block_rows*n_graph_slots or scalar-prefetch per-block graph
            # offsets and accumulate into a pl.ds-sliced acc window.
            dimension_semantics=("arbitrary",),
            vmem_limit_bytes=32 * 1024 * 1024,
        ),
    )(H_bf, gid_p, W_emb, b_emb, inv_sqrt_n, W1, b1, W2, b2)

    def graphs(s):
        return out[s * b_pad: s * b_pad + batch_size, :out_size]

    return (graphs(0), graphs(1), graphs(2),
            pd[:batch_size, 0], nd[:batch_size, 0], loss[0, 0])


# ----------------------------------------------------------------------------
# Pure-JAX reference (same bf16 MXU operand casts) for a correctness check.
# ----------------------------------------------------------------------------
def reference_forward(subsets, params, batch_size, out_size, neg_thresh):
    def bf(x):
        return x.astype(jnp.bfloat16).astype(jnp.float32)

    W_emb, b_emb = params["W_emb"], params["b_emb"]
    W1, b1, W2, b2 = params["W1"], params["b1"], params["W2"], params["b2"]

    def encode(H, beta, bid):
        t_embed = jnp.stack([beta, jnp.sin(beta), jnp.cos(beta)], axis=-1)
        Hc = jnp.concatenate([H, t_embed], axis=-1)
        emb = bf(Hc) @ bf(W_emb) + b_emb
        n = jnp.zeros((batch_size,), jnp.float32).at[bid].add(1.0)
        # segment sum over bf16-rounded emb (mirrors the kernel's bf16 MXU operands)
        pooled = jnp.zeros((batch_size, emb.shape[1]), jnp.float32).at[bid].add(bf(emb))
        pooled = pooled / jnp.sqrt(jnp.maximum(n, 1.0))[:, None]
        x = pooled * jax.nn.sigmoid(pooled)
        x = bf(x) @ bf(W1) + b1
        x = x * jax.nn.sigmoid(x)
        return bf(x) @ bf(W2) + b2

    ref_H = encode(*subsets[0])
    pos_H = encode(*subsets[1])
    neg_H = encode(*subsets[2])
    pd = jnp.linalg.norm(ref_H - pos_H, axis=-1)
    nd = jnp.linalg.norm(ref_H - neg_H, axis=-1)
    loss = jnp.mean(pd) + jnp.mean(jnp.maximum(neg_thresh - nd, 0.0))
    return ref_H, pos_H, neg_H, pd, nd, loss


# ----------------------------------------------------------------------------
# Deterministic parameter init (shapes from IFEncoder.__init__)
# ----------------------------------------------------------------------------
def init_params(key, embed_size, hidden_size, out_size):
    ks = jax.random.split(key, 8)

    def lin(kw, kb, fan_in, fan_out):
        bound = 1.0 / jnp.sqrt(fan_in)
        W = jax.random.uniform(kw, (fan_in, fan_out), jnp.float32, -bound, bound)
        b = jax.random.uniform(kb, (1, fan_out), jnp.float32, -bound, bound)
        return W, b

    W_emb, b_emb = lin(ks[0], ks[1], embed_size + 3, hidden_size)
    W1, b1 = lin(ks[2], ks[3], hidden_size, hidden_size)
    W2, b2 = lin(ks[4], ks[5], hidden_size, out_size)
    atom_embed = jax.random.normal(ks[6], (hidden_size // 4,), jnp.float32)  # unused (encoder stub)
    return {
        "W_emb": W_emb,        # [E+3, hidden]: rows [H feats | beta | sin | cos]
        "b_emb": b_emb,
        "W1": W1, "b1": b1,
        "W2": W2, "b2": b2,
        "atom_embed": atom_embed,
    }


if __name__ == "__main__":
    key = jax.random.PRNGKey(0)
    B = 2                     # graphs per batch
    nodes_per_graph = 96
    N = B * nodes_per_graph
    embed_size = 8            # ldm.autoencoder.latent_size stand-in
    hidden_size = 32
    out_size = 16
    neg_thresh = 10.0
    num_steps = 100

    k_param, k_h, k_z, k_t, k_n1, k_n2, k_n3 = jax.random.split(key, 7)
    params = init_params(k_param, embed_size, hidden_size, out_size)

    # Stand-ins for prepare_inputs() outputs (LDM encode is checkpoint-bound).
    H_0 = jax.random.normal(k_h, (N, embed_size), jnp.float32)   # latent node feats
    Z_0 = jax.random.normal(k_z, (N, 3), jnp.float32)            # positions (only feed the stubbed encoder)
    batch_ids = jnp.repeat(jnp.arange(B, dtype=jnp.int32), nodes_per_graph)

    t = jax.random.randint(k_t, (B,), 0, num_steps + 1)
    # TODO(synk): exact ldm.diffusion.trans_x.get_timestamp schedule is checkpoint-bound; linear beta stand-in.
    beta_sched = jnp.linspace(1e-4, 2e-2, num_steps + 1, dtype=jnp.float32)
    beta_nodes = beta_sched[t][batch_ids]                        # [N]

    # TODO(synk): rejection-sampled pos/neg masks replaced by deterministic even/odd split.
    idx = jnp.arange(N)
    pos_idx = idx[idx % 2 == 0]
    neg_idx = idx[idx % 2 == 1]

    def subset(ids, noise_key):
        H = H_0[ids]
        # TODO(synk): ldm.diffusion.trans_h.add_noise is checkpoint-bound; gaussian stand-in.
        H = H + 0.1 * jax.random.normal(noise_key, H.shape, jnp.float32)
        return (H, beta_nodes[ids], batch_ids[ids])

    subsets = [subset(pos_idx, k_n1),    # ref
               subset(pos_idx, k_n2),    # pos
               subset(neg_idx, k_n3)]    # neg

    # block_rows=128 here to exercise the multi-block accumulation path at this
    # demo size; at real N use the 512-2048 default.
    ref_H, pos_H, neg_H, pos_dist, neg_dist, loss = ifencoder_forward(
        subsets, params, B, embed_size, hidden_size, out_size, neg_thresh,
        block_rows=128)
    jax.block_until_ready((ref_H, pos_H, neg_H, pos_dist, neg_dist, loss))

    assert ref_H.shape == (B, out_size)
    assert pos_dist.shape == (B,) and neg_dist.shape == (B,)
    assert loss.shape == ()

    r_ref, r_pos, r_neg, r_pd, r_nd, r_loss = reference_forward(
        subsets, params, B, out_size, neg_thresh)
    ok = (jnp.allclose(ref_H, r_ref, rtol=1e-2, atol=1e-2)
          and jnp.allclose(pos_H, r_pos, rtol=1e-2, atol=1e-2)
          and jnp.allclose(neg_H, r_neg, rtol=1e-2, atol=1e-2)
          and jnp.allclose(pos_dist, r_pd, rtol=1e-2, atol=1e-2)
          and jnp.allclose(neg_dist, r_nd, rtol=1e-2, atol=1e-2)
          and jnp.allclose(loss, r_loss, rtol=1e-2, atol=1e-2))
    assert bool(ok), "Pallas kernel output mismatch vs pure-JAX reference"
    print("KERNEL_OK")
</pallas_src>

<mosaic_0001>
module attributes {stable_mosaic.version = 11 : i64} {
  func.func @ifencoder_fused_kernel(%arg0: i32, %arg1: memref<128x16xbf16, #tpu.memory_space<vmem>>, %arg2: memref<1x128xi32, #tpu.memory_space<vmem>>, %arg3: memref<16x128xbf16, #tpu.memory_space<vmem>>, %arg4: memref<1x128xf32, #tpu.memory_space<vmem>>, %arg5: memref<24x1xf32, #tpu.memory_space<vmem>>, %arg6: memref<128x128xbf16, #tpu.memory_space<vmem>>, %arg7: memref<1x128xf32, #tpu.memory_space<vmem>>, %arg8: memref<128x128xbf16, #tpu.memory_space<vmem>>, %arg9: memref<1x128xf32, #tpu.memory_space<vmem>>, %arg10: memref<24x128xf32, #tpu.memory_space<vmem>>, %arg11: memref<8x1xf32, #tpu.memory_space<vmem>>, %arg12: memref<8x1xf32, #tpu.memory_space<vmem>>, %arg13: memref<1x1xf32, #tpu.memory_space<vmem>>, %arg14: memref<24x128xf32, #tpu.memory_space<vmem>>) attributes {dimension_semantics = [#tpu.dimension_semantics<arbitrary>], iteration_bounds = array<i64: 3>, scalar_prefetch = 0 : i64, scratch_operands = 1 : i64, tpu.core_type = #tpu.core_type<tc>, window_params = [{transform_indices = @transform_0, window_bounds = array<i64: 128, 16>}, {transform_indices = @transform_1, window_bounds = array<i64: 1, 128>}, {pipeline_mode = #tpu.pipeline_mode<synchronous>, transform_indices = @transform_2, window_bounds = array<i64: 16, 128>}, {pipeline_mode = #tpu.pipeline_mode<synchronous>, transform_indices = @transform_3, window_bounds = array<i64: 1, 128>}, {pipeline_mode = #tpu.pipeline_mode<synchronous>, transform_indices = @transform_4, window_bounds = array<i64: 24, 1>}, {pipeline_mode = #tpu.pipeline_mode<synchronous>, transform_indices = @transform_5, window_bounds = array<i64: 128, 128>}, {pipeline_mode = #tpu.pipeline_mode<synchronous>, transform_indices = @transform_6, window_bounds = array<i64: 1, 128>}, {pipeline_mode = #tpu.pipeline_mode<synchronous>, transform_indices = @transform_7, window_bounds = array<i64: 128, 128>}, {pipeline_mode = #tpu.pipeline_mode<synchronous>, transform_indices = @transform_8, window_bounds = array<i64: 1, 128>}, {pipeline_mode = #tpu.pipeline_mode<synchronous>, transform_indices = @transform_9, window_bounds = array<i64: 24, 128>}, {pipeline_mode = #tpu.pipeline_mode<synchronous>, transform_indices = @transform_10, window_bounds = array<i64: 8, 1>}, {pipeline_mode = #tpu.pipeline_mode<synchronous>, transform_indices = @transform_11, window_bounds = array<i64: 8, 1>}, {pipeline_mode = #tpu.pipeline_mode<synchronous>, transform_indices = @transform_12, window_bounds = array<i64: 1, 1>}]} {
    %c0_i32 = arith.constant 0 : i32
    %0 = arith.cmpi eq, %arg0, %c0_i32 : i32
    %1 = arith.extui %0 : i1 to i32
    %c0_i32_0 = arith.constant 0 : i32
    %2 = arith.cmpi ne, %1, %c0_i32_0 : i32
    scf.if %2 {
      %cst_14 = arith.constant 0.000000e+00 : f32
      %24 = vector.broadcast %cst_14 : f32 to vector<24x128xf32>
      %c0_15 = arith.constant 0 : index
      %c0_16 = arith.constant 0 : index
      %25 = vector.load %arg14[%c0_15, %c0_16] : memref<24x128xf32, #tpu.memory_space<vmem>>, vector<24x128xf32>
      tpu.vector_store %arg14[%c0_15, %c0_16], %24 {strides = array<i32>} : memref<24x128xf32, #tpu.memory_space<vmem>>, vector<24x128xf32>,
    } else {
    }
    %c0 = arith.constant 0 : index
    %c0_1 = arith.constant 0 : index
    %3 = vector.load %arg1[%c0, %c0_1] : memref<128x16xbf16, #tpu.memory_space<vmem>>, vector<128x16xbf16>
    %c0_2 = arith.constant 0 : index
    %c0_3 = arith.constant 0 : index
    %4 = vector.load %arg3[%c0_2, %c0_3] : memref<16x128xbf16, #tpu.memory_space<vmem>>, vector<16x128xbf16>
    %cst = arith.constant dense<0.000000e+00> : vector<128x128xf32>
    %5 = tpu.matmul %3, %4, %cst {dimension_numbers = #tpu.dot_dimension_numbers<[1], [0], [0], [1], [0, 0, 1, 1], [], []>} : vector<128x16xbf16>, vector<16x128xbf16>, vector<128x128xf32> -> vector<128x128xf32>
    %c0_4 = arith.constant 0 : index
    %c0_5 = arith.constant 0 : index
    %6 = vector.load %arg4[%c0_4, %c0_5] : memref<1x128xf32, #tpu.memory_space<vmem>>, vector<1x128xf32>
    %7 = vector.broadcast %6 : vector<1x128xf32> to vector<128x128xf32>
    %8 = arith.addf %5, %7 : vector<128x128xf32>
    %c0_6 = arith.constant 0 : index
    %c0_7 = arith.constant 0 : index
    %9 = vector.load %arg2[%c0_6, %c0_7] : memref<1x128xi32, #tpu.memory_space<vmem>>, vector<1x128xi32>
    %10 = tpu.iota {dimensions = array<i32: 0>} : vector<24x128xi32>
    %11 = vector.broadcast %9 : vector<1x128xi32> to vector<24x128xi32>
    %12 = arith.cmpi eq, %10, %11 : vector<24x128xi32>
    %13 = arith.extui %12 : vector<24x128xi1> to vector<24x128xi32>
    %14 = arith.sitofp %13 : vector<24x128xi32> to vector<24x128xf32>
    %15 = arith.truncf %14 : vector<24x128xf32> to vector<24x128xbf16>
    %c0_8 = arith.constant 0 : index
    %c0_9 = arith.constant 0 : index
    %16 = vector.load %arg14[%c0_8, %c0_9] : memref<24x128xf32, #tpu.memory_space<vmem>>, vector<24x128xf32>
    %17 = arith.truncf %8 : vector<128x128xf32> to vector<128x128xbf16>
    %cst_10 = arith.constant dense<0.000000e+00> : vector<24x128xf32>
    %18 = tpu.matmul %15, %17, %cst_10 {dimension_numbers = #tpu.dot_dimension_numbers<[1], [0], [0], [1], [0, 0, 1, 1], [], []>} : vector<24x128xbf16>, vector<128x128xbf16>, vector<24x128xf32> -> vector<24x128xf32>
    %19 = arith.addf %16, %18 : vector<24x128xf32>
    %c0_11 = arith.constant 0 : index
    %c0_12 = arith.constant 0 : index
    %20 = vector.load %arg14[%c0_11, %c0_12] : memref<24x128xf32, #tpu.memory_space<vmem>>, vector<24x128xf32>
    tpu.vector_store %arg14[%c0_11, %c0_12], %19 {strides = array<i32>} : memref<24x128xf32, #tpu.memory_space<vmem>>, vector<24x128xf32>,
    %c2_i32 = arith.constant 2 : i32
    %21 = arith.cmpi eq, %arg0, %c2_i32 : i32
    %22 = arith.extui %21 : i1 to i32
    %c0_i32_13 = arith.constant 0 : i32
    %23 = arith.cmpi ne, %22, %c0_i32_13 : i32
    scf.if %23 {
      %c0_14 = arith.constant 0 : index
      %c0_15 = arith.constant 0 : index
      %24 = vector.load %arg14[%c0_14, %c0_15] : memref<24x128xf32, #tpu.memory_space<vmem>>, vector<24x128xf32>
      %c0_16 = arith.constant 0 : index
      %c0_17 = arith.constant 0 : index
      %25 = vector.load %arg5[%c0_16, %c0_17] : memref<24x1xf32, #tpu.memory_space<vmem>>, vector<24x1xf32>
      %26 = vector.broadcast %25 : vector<24x1xf32> to vector<24x128xf32>
      %27 = arith.mulf %24, %26 : vector<24x128xf32>
      %28 = arith.negf %27 : vector<24x128xf32>
      %29 = math.exp %28 : vector<24x128xf32>
      %cst_18 = arith.constant 1.000000e+00 : f32
      %30 = vector.broadcast %cst_18 : f32 to vector<24x128xf32>
      %31 = arith.addf %30, %29 : vector<24x128xf32>
      %32 = arith.divf %30, %31 : vector<24x128xf32>
      %33 = arith.mulf %27, %32 : vector<24x128xf32>
      %34 = arith.truncf %33 : vector<24x128xf32> to vector<24x128xbf16>
      %c0_19 = arith.constant 0 : index
      %c0_20 = arith.constant 0 : index
      %35 = vector.load %arg6[%c0_19, %c0_20] : memref<128x128xbf16, #tpu.memory_space<vmem>>, vector<128x128xbf16>
      %cst_21 = arith.constant dense<0.000000e+00> : vector<24x128xf32>
      %36 = tpu.matmul %34, %35, %cst_21 {dimension_numbers = #tpu.dot_dimension_numbers<[1], [0], [0], [1], [0, 0, 1, 1], [], []>} : vector<24x128xbf16>, vector<128x128xbf16>, vector<24x128xf32> -> vector<24x128xf32>
      %c0_22 = arith.constant 0 : index
      %c0_23 = arith.constant 0 : index
      %37 = vector.load %arg7[%c0_22, %c0_23] : memref<1x128xf32, #tpu.memory_space<vmem>>, vector<1x128xf32>
      %38 = vector.broadcast %37 : vector<1x128xf32> to vector<24x128xf32>
      %39 = arith.addf %36, %38 : vector<24x128xf32>
      %40 = arith.negf %39 : vector<24x128xf32>
      %41 = math.exp %40 : vector<24x128xf32>
      %cst_24 = arith.constant 1.000000e+00 : f32
      %42 = vector.broadcast %cst_24 : f32 to vector<24x128xf32>
      %43 = arith.addf %42, %41 : vector<24x128xf32>
      %44 = arith.divf %42, %43 : vector<24x128xf32>
      %45 = arith.mulf %39, %44 : vector<24x128xf32>
      %46 = arith.truncf %45 : vector<24x128xf32> to vector<24x128xbf16>
      %c0_25 = arith.constant 0 : index
      %c0_26 = arith.constant 0 : index
      %47 = vector.load %arg8[%c0_25, %c0_26] : memref<128x128xbf16, #tpu.memory_space<vmem>>, vector<128x128xbf16>
      %cst_27 = arith.constant dense<0.000000e+00> : vector<24x128xf32>
      %48 = tpu.matmul %46, %47, %cst_27 {dimension_numbers = #tpu.dot_dimension_numbers<[1], [0], [0], [1], [0, 0, 1, 1], [], []>} : vector<24x128xbf16>, vector<128x128xbf16>, vector<24x128xf32> -> vector<24x128xf32>
      %c0_28 = arith.constant 0 : index
      %c0_29 = arith.constant 0 : index
      %49 = vector.load %arg9[%c0_28, %c0_29] : memref<1x128xf32, #tpu.memory_space<vmem>>, vector<1x128xf32>
      %50 = vector.broadcast %49 : vector<1x128xf32> to vector<24x128xf32>
      %51 = arith.addf %48, %50 : vector<24x128xf32>
      %c0_30 = arith.constant 0 : index
      %c0_31 = arith.constant 0 : index
      %52 = vector.load %arg10[%c0_30, %c0_31] : memref<24x128xf32, #tpu.memory_space<vmem>>, vector<24x128xf32>
      tpu.vector_store %arg10[%c0_30, %c0_31], %51 {strides = array<i32>} : memref<24x128xf32, #tpu.memory_space<vmem>>, vector<24x128xf32>,
      %53 = vector.extract_strided_slice %51 {offsets = [0, 0], sizes = [8, 128], strides = [1, 1]} : vector<24x128xf32> to vector<8x128xf32>
      %54 = vector.extract_strided_slice %51 {offsets = [8, 0], sizes = [8, 128], strides = [1, 1]} : vector<24x128xf32> to vector<8x128xf32>
      %55 = vector.extract_strided_slice %51 {offsets = [16, 0], sizes = [8, 128], strides = [1, 1]} : vector<24x128xf32> to vector<8x128xf32>
      %56 = arith.subf %53, %54 : vector<8x128xf32>
      %57 = arith.subf %53, %55 : vector<8x128xf32>
      %58 = arith.mulf %56, %56 : vector<8x128xf32>
      %cst_32 = arith.constant dense<0.000000e+00> : vector<8xf32>
      %59 = vector.multi_reduction <add>, %58, %cst_32 [1] : vector<8x128xf32> to vector<8xf32>
      %60 = vector.shape_cast %59 : vector<8xf32> to vector<8x1xf32>
      %61 = math.sqrt %60 : vector<8x1xf32>
      %62 = arith.mulf %57, %57 : vector<8x128xf32>
      %cst_33 = arith.constant dense<0.000000e+00> : vector<8xf32>
      %63 = vector.multi_reduction <add>, %62, %cst_33 [1] : vector<8x128xf32> to vector<8xf32>
      %64 = vector.shape_cast %63 : vector<8xf32> to vector<8x1xf32>
      %65 = math.sqrt %64 : vector<8x1xf32>
      %c0_34 = arith.constant 0 : index
      %c0_35 = arith.constant 0 : index
      %66 = vector.load %arg11[%c0_34, %c0_35] : memref<8x1xf32, #tpu.memory_space<vmem>>, vector<8x1xf32>
      tpu.vector_store %arg11[%c0_34, %c0_35], %61 {strides = array<i32>} : memref<8x1xf32, #tpu.memory_space<vmem>>, vector<8x1xf32>,
      %c0_36 = arith.constant 0 : index
      %c0_37 = arith.constant 0 : index
      %67 = vector.load %arg12[%c0_36, %c0_37] : memref<8x1xf32, #tpu.memory_space<vmem>>, vector<8x1xf32>
      tpu.vector_store %arg12[%c0_36, %c0_37], %65 {strides = array<i32>} : memref<8x1xf32, #tpu.memory_space<vmem>>, vector<8x1xf32>,
      %68 = tpu.iota {dimensions = array<i32: 0>} : vector<8x1xi32>
      %c2_i32_38 = arith.constant 2 : i32
      %69 = vector.broadcast %c2_i32_38 : i32 to vector<8x1xi32>
      %70 = arith.cmpi slt, %68, %69 : vector<8x1xi32>
      %71 = arith.extui %70 : vector<8x1xi1> to vector<8x1xi32>
      %72 = arith.sitofp %71 : vector<8x1xi32> to vector<8x1xf32>
      %cst_39 = arith.constant 1.000000e+01 : f32
      %73 = vector.broadcast %cst_39 : f32 to vector<8x1xf32>
      %74 = arith.subf %73, %65 : vector<8x1xf32>
      %cst_40 = arith.constant 0.000000e+00 : f32
      %75 = vector.broadcast %cst_40 : f32 to vector<8x1xf32>
      %76 = arith.maximumf %74, %75 : vector<8x1xf32>
      %77 = arith.mulf %61, %72 : vector<8x1xf32>
      %cst_41 = arith.constant dense<0.000000e+00> : vector<1xf32>
      %78 = vector.multi_reduction <add>, %77, %cst_41 [0] : vector<8x1xf32> to vector<1xf32>
      %79 = vector.shape_cast %78 : vector<1xf32> to vector<1x1xf32>
      %80 = arith.mulf %76, %72 : vector<8x1xf32>
      %cst_42 = arith.constant dense<0.000000e+00> : vector<1xf32>
      %81 = vector.multi_reduction <add>, %80, %cst_42 [0] : vector<8x1xf32> to vector<1xf32>
      %82 = vector.shape_cast %81 : vector<1xf32> to vector<1x1xf32>
      %83 = arith.addf %79, %82 : vector<1x1xf32>
      %cst_43 = arith.constant 5.000000e-01 : f32
      %84 = vector.broadcast %cst_43 : f32 to vector<1x1xf32>
      %85 = arith.mulf %83, %84 : vector<1x1xf32>
      %c0_44 = arith.constant 0 : index
      %c0_45 = arith.constant 0 : index
      %86 = vector.load %arg13[%c0_44, %c0_45] : memref<1x1xf32, #tpu.memory_space<vmem>>, vector<1x1xf32>
      tpu.vector_store %arg13[%c0_44, %c0_45], %85 {strides = array<i32>} : memref<1x1xf32, #tpu.memory_space<vmem>>, vector<1x1xf32>,
    } else {
    }
    return
  }
  func.func @transform_0(%arg0: i32) -> (i32, i32) {
    %c0_i32 = arith.constant 0 : i32
    %c0_i32_0 = arith.constant 0 : i32
    return %arg0, %c0_i32 : i32, i32
  }
  func.func @transform_1(%arg0: i32) -> (i32, i32) {
    %c0_i32 = arith.constant 0 : i32
    %c0_i32_0 = arith.constant 0 : i32
    return %c0_i32, %arg0 : i32, i32
  }
  func.func @transform_2(%arg0: i32) -> (i32, i32) {
    %c0_i32 = arith.constant 0 : i32
    %c0_i32_0 = arith.constant 0 : i32
    %c0_i32_1 = arith.constant 0 : i32
    return %c0_i32, %c0_i32_0 : i32, i32
  }
  func.func @transform_3(%arg0: i32) -> (i32, i32) {
    %c0_i32 = arith.constant 0 : i32
    %c0_i32_0 = arith.constant 0 : i32
    %c0_i32_1 = arith.constant 0 : i32
    return %c0_i32, %c0_i32_0 : i32, i32
  }
  func.func @transform_4(%arg0: i32) -> (i32, i32) {
    %c0_i32 = arith.constant 0 : i32
    %c0_i32_0 = arith.constant 0 : i32
    %c0_i32_1 = arith.constant 0 : i32
    return %c0_i32, %c0_i32_0 : i32, i32
  }
  func.func @transform_5(%arg0: i32) -> (i32, i32) {
    %c0_i32 = arith.constant 0 : i32
    %c0_i32_0 = arith.constant 0 : i32
    %c0_i32_1 = arith.constant 0 : i32
    return %c0_i32, %c0_i32_0 : i32, i32
  }
  func.func @transform_6(%arg0: i32) -> (i32, i32) {
    %c0_i32 = arith.constant 0 : i32
    %c0_i32_0 = arith.constant 0 : i32
    %c0_i32_1 = arith.constant 0 : i32
    return %c0_i32, %c0_i32_0 : i32, i32
  }
  func.func @transform_7(%arg0: i32) -> (i32, i32) {
    %c0_i32 = arith.constant 0 : i32
    %c0_i32_0 = arith.constant 0 : i32
    %c0_i32_1 = arith.constant 0 : i32
    return %c0_i32, %c0_i32_0 : i32, i32
  }
  func.func @transform_8(%arg0: i32) -> (i32, i32) {
    %c0_i32 = arith.constant 0 : i32
    %c0_i32_0 = arith.constant 0 : i32
    %c0_i32_1 = arith.constant 0 : i32
    return %c0_i32, %c0_i32_0 : i32, i32
  }
  func.func @transform_9(%arg0: i32) -> (i32, i32) {
    %c0_i32 = arith.constant 0 : i32
    %c0_i32_0 = arith.constant 0 : i32
    %c0_i32_1 = arith.constant 0 : i32
    return %c0_i32, %c0_i32_0 : i32, i32
  }
  func.func @transform_10(%arg0: i32) -> (i32, i32) {
    %c0_i32 = arith.constant 0 : i32
    %c0_i32_0 = arith.constant 0 : i32
    %c0_i32_1 = arith.constant 0 : i32
    return %c0_i32, %c0_i32_0 : i32, i32
  }
  func.func @transform_11(%arg0: i32) -> (i32, i32) {
    %c0_i32 = arith.constant 0 : i32
    %c0_i32_0 = arith.constant 0 : i32
    %c0_i32_1 = arith.constant 0 : i32
    return %c0_i32, %c0_i32_0 : i32, i32
  }
  func.func @transform_12(%arg0: i32) -> (i32, i32) {
    %c0_i32 = arith.constant 0 : i32
    %c0_i32_0 = arith.constant 0 : i32
    %c0_i32_1 = arith.constant 0 : i32
    return %c0_i32, %c0_i32_0 : i32, i32
  }
}

</mosaic_0001>

<bundles_post_ra>
// kernel: tpu_custom_call.1
= control target key start
LH: loop header
LB: loop body
LE: loop exit
PB: predicated region body
PF: predicated region fallthrough
CT: control target
= control target key end

     0   :  { %18 = vsyncpa [#allocation4], 0  ;;  %s1627_s0 = inlined_call_operand.vmem [shape: bf16[384,16], index: 0, kind: input, shape index: {}]   ;;  %s1628_s1 = inlined_call_operand.vmem [shape: s32[1,384], index: 1, kind: input, shape index: {}]   ;;  %s1629_s2 = inlined_call_operand.vmem [shape: bf16[16,128], index: 2, kind: input, shape index: {}]   ;;  %s1630_s3 = inlined_call_operand.vmem [shape: f32[1,128], index: 3, kind: input, shape index: {}]   ;;  %s1631_s4 = inlined_call_operand.vmem [shape: f32[24,1], index: 4, kind: input, shape index: {}]   ;;  %s1632_s5 = inlined_call_operand.vmem [shape: bf16[128,128], index: 5, kind: input, shape index: {}]   ;;  %s1633_s6 = inlined_call_operand.vmem [shape: f32[1,128], index: 6, kind: input, shape index: {}]   ;;  %s1634_s7 = inlined_call_operand.vmem [shape: bf16[128,128], index: 7, kind: input, shape index: {}]   ;;  %s1635_s8 = inlined_call_operand.vmem [shape: f32[1,128], index: 8, kind: input, shape index: {}]   ;;  %s1636_s9 = inlined_call_operand.hbm [shape: f32[24,128], index: 9, kind: output, shape index: {0}]   ;;  %s1637_s10 = inlined_call_operand.vmem [shape: f32[8,1], index: 10, kind: output, shape index: {1}]   ;;  %s1638_s11 = inlined_call_operand.vmem [shape: f32[8,1], index: 11, kind: output, shape index: {2}]   ;;  %s1639_s12 = inlined_call_operand.hbm [shape: f32[1,1], index: 12, kind: output, shape index: {3}]  }
   0x1   :  { %19 = vsyncpa [#allocation6], 0  ;;  %s1485_s21 = smov 0  }
   0x2 LB: > { %s1491_s22 = sadd.s32 4294967295, %s1410_s21   ;;  %p1094_p0 = scmp.ge.s32.totalorder %s1410_s21, 1  ;;  %s1410_s21 = sphi %s1485_s21, %s25_s21  }
   0x3   : > { %p360_p1 = scmp.lt.s32.totalorder %s1410_s21, 4 }
   0x5   : > { %p361_p2 = pnand %p1094_p0, %p360_p1 }
   0x6   : > { %s1095_s23 = sshll.u32 (!%p361_p2), %s1491_s22, 4  ;;  %p406_p3 = scmp.lt.s32.totalorder (!%p361_p2), %s1491_s22, 2 }
   0x7   : > { %364 = sbr.rel (%p361_p2) target bundleno = 999 (0x3e7), region = 56  ;;  %p401_p4 = scmp.lt.s32.totalorder (!%p361_p2), %s1095_s23, 47 }
   0x8   : > { %p1097_p5 = scmp.ne.s32.totalorder (!%p361_p2), %s1491_s22, 0 }
   0xc   : > { %s1498_s24 = scalar_select %p406_p3, %s1491_s22, 2 }
   0xd   : > { %s1641_s23 = smov (!%p401_p4, %s1095_s23), 47  ;;  %413 = sbr.rel (%p1097_p5) target bundleno = 22 (0x16), region = 60 }
   0xe   : > { %s408_s27 = scalar_lea.vmem %s1628_s1, %s1498_s24  ;;  %s1096_s28 = sshll.u32 %s1641_s23, 2 }
   0xf   : > { %s404_s13 = scalar_lea.vmem %s1627_s0, %s1096_s28 }
  0x12   : > { %v1412_v0 = vmov 0.0  }
  0x13   : > { %414 = vst [vmem:[#allocation2 + $0x10] sm:$0xff] %v1412_v0 }
  0x14   : > { %415 = vst [vmem:[#allocation2] sm:$0xff] %v1412_v0 }
  0x15   : > { %416 = vst [vmem:[#allocation2 + $0x8] sm:$0xff] %v1412_v0 }
  0x16 PF: > { %v1235_v1 = vld [vmem:[%s1629_s2] sm:$0xff]  ;;  %v1230_v2 = vld [vmem:[%s404_s13 + $0x18] sm:$0xff]  ;;  %v1233_v3 = vld [vmem:[%s404_s13 + $0x30] sm:$0xff]  ;;  %vm485_vm0 = vcmask 130048   ;;  %v560_v41 = vlaneseq  ;;  %v1413_v56 = vmov 1.0|1.0  }
  0x17   : > { %1252 = vmatpush.bf16.msra.mxu2 %v1235_v1  ;;  %1253 = vmatpush.bf16.msra.mxu3 %v1235_v1  ;;  %v1227_v4 = vld [vmem:[%s404_s13] sm:$0xff]  ;;  %v1234_v6 = vld [vmem:[%s404_s13 + $0x38] sm:$0xff]  ;;  %v1228_v7 = vld [vmem:[%s404_s13 + $0x8] sm:$0xff]  ;;  %p1149_p6 = scmp.ne.s32.totalorder %s1491_s22, 2 }
  0x18   : > { %517 = vmatpush.bf16.msra.mxu0 %v1235_v1  ;;  %v1231_v5 = vld [vmem:[%s404_s13 + $0x20] sm:$0xff]  ;;  %v1232_v8 = vld [vmem:[%s404_s13 + $0x28] sm:$0xff]  ;;  %v1229_v9 = vld [vmem:[%s404_s13 + $0x10] sm:$0xff]  ;;  %v1514_v45 = vshrl.u32 %v560_v41, 7 }
  0x19   : > { %v1306_v19 = vld [vmem:[%s1630_s3] ss:$0 sm:$0xff] }
  0x1a   : > { %1137 = vmatmul.msk.bf16.vlgmr.msra.gmra.mxu2 %vm485_vm0, %v1230_v2  ;;  %1140 = vmatmul.msk.bf16.vlgmr.msra.gmra.mxu3 %vm485_vm0, %v1233_v3  ;;  %v562_v49 = vadd.s32 8, %v1514_v45  ;;  %v1307_v50 = vld [vmem:[%s408_s27] ss:$0 sm:$0xff]  ;;  %v563_v51 = vadd.s32 16, %v1514_v45  ;;  %v576_v57 = vld [vmem:[#allocation2 + $0x10] sm:$0xff] }
  0x1b   : > { %1134 = vmatmul.msk.bf16.vlgmr.msra.gmra.mxu0 %vm485_vm0, %v1227_v4  ;;  %vm565_vm1 = vcmp.eq.s32.totalorder %v1514_v45, %v1307_v50  ;;  %v577_v62 = vld [vmem:[#allocation2] sm:$0xff] }
  0x1c   : > { %vm566_vm2 = vcmp.eq.s32.totalorder %v562_v49, %v1307_v50  ;;  %vm567_vm3 = vcmp.eq.s32.totalorder %v563_v51, %v1307_v50  ;;  %v578_v60 = vld [vmem:[#allocation2 + $0x8] sm:$0xff] }
  0x1d   : > { %vm1145_vm4 = vmpackc.low %vm566_vm2, %vm565_vm1 }
  0x1e   : > { %vm1147_vm5 = vmpackc.low %vm567_vm3, %vm567_vm3 }
  0x2a   : > { %1138 = vmatmul.msk.bf16.gmra.mxu2 %vm485_vm0, %v1231_v5  ;;  %1141 = vmatmul.msk.bf16.gmra.mxu3 %vm485_vm0, %v1234_v6 }
  0x2b   : > { %1135 = vmatmul.msk.bf16.gmra.mxu0 %vm485_vm0, %v1228_v7 }
  0x3a   : > { %1139 = vmatmul.msk.bf16.gmra.mxu2 %vm485_vm0, %v1232_v8 }
  0x3b   : > { %1136 = vmatmul.msk.bf16.gmra.mxu0 %vm485_vm0, %v1229_v9 }
  0x98   : > { %v519_v10 = vpop.f32.mrf.mxu0 }
  0x99   : > { %v520_v52 = vadd.f32 %v1306_v19, %v519_v10 }
  0x9d   : > { %v534_v11 = vpop.f32.mrf.mxu2  ;;  %v549_v12 = vpop.f32.mrf.mxu3 }
  0x9e   : > { %v550_v24 = vadd.f32 %v1306_v19, %v549_v12  ;;  %v535_v40 = vadd.f32 %v1306_v19, %v534_v11 }
  0xa0   : > { %v521_v13 = vpop.f32.mrf.mxu0 }
  0xa1   : > { %v522_v53 = vadd.f32 %v1306_v19, %v521_v13 }
  0xa3   : > { %v579_v55 = vpack.c.bf16 %v522_v53, %v520_v52 }
  0xa5   : > { %v536_v14 = vpop.f32.mrf.mxu2  ;;  %v551_v15 = vpop.f32.mrf.mxu3 }
  0xa6   : > { %v552_v25 = vadd.f32 %v1306_v19, %v551_v15  ;;  %v537_v37 = vadd.f32 %v1306_v19, %v536_v14 }
  0xa8   : > { %v524_v18 = vpop.f32.mrf.mxu0  ;;  %v585_v28 = vpack.c.bf16 %v552_v25, %v550_v24  ;;  %v582_v44 = vpack.c.bf16 %v537_v37, %v535_v40 }
  0xa9   : > { %v525_v46 = vadd.f32 %v1306_v19, %v524_v18 }
  0xad   : > { %v539_v16 = vpop.f32.mrf.mxu2  ;;  %v554_v17 = vpop.f32.mrf.mxu3 }
  0xae   : > { %v555_v20 = vadd.f32 %v1306_v19, %v554_v17  ;;  %v540_v36 = vadd.f32 %v1306_v19, %v539_v16 }
  0xb0   : > { %v526_v27 = vpop.f32.mrf.mxu0 }
  0xb1   : > { %v527_v47 = vadd.f32 %v1306_v19, %v526_v27 }
  0xb3   : > { %v580_v54 = vpack.c.bf16 %v527_v47, %v525_v46 }
  0xb5   : > { %v541_v21 = vpop.f32.mrf.mxu2  ;;  %v556_v22 = vpop.f32.mrf.mxu3 }
  0xb6   : > { %v557_v23 = vadd.f32 %v1306_v19, %v556_v22  ;;  %v542_v34 = vadd.f32 %v1306_v19, %v541_v21 }
  0xb8   : > { %v586_v26 = vpack.c.bf16 %v557_v23, %v555_v20  ;;  %v529_v30 = vpop.f32.mrf.mxu0  ;;  %v583_v38 = vpack.c.bf16 %v542_v34, %v540_v36 }
  0xb9   : > { %v530_v42 = vadd.f32 %v1306_v19, %v529_v30 }
  0xba   : > { %587 = vmatpush.bf16.msra.mxu1 %v586_v26  ;;  %1254 = vmatpush.bf16.msrb.mxu3 %v586_v26 }
  0xbd   : > { %v544_v29 = vpop.f32.mrf.mxu2 }
  0xbe   : > { %588 = vmatpush.bf16.msra.mxu1 %v585_v28  ;;  %1255 = vmatpush.bf16.msrb.mxu3 %v585_v28  ;;  %v545_v32 = vadd.f32 %v1306_v19, %v544_v29 }
  0xc0   : > { %v531_v39 = vpop.f32.mrf.mxu0 }
  0xc1   : > { %v532_v43 = vadd.f32 %v1306_v19, %v531_v39 }
  0xc3   : > { %v581_v48 = vpack.c.bf16 %v532_v43, %v530_v42 }
  0xc5   : > { %v546_v31 = vpop.f32.mrf.mxu2 }
  0xc6   : > { %v547_v33 = vadd.f32 %v1306_v19, %v546_v31 }
  0xc8   : > { %v584_v35 = vpack.c.bf16 %v547_v33, %v545_v32 }
  0xca   : > { %589 = vmatpush.bf16.msra.mxu1 %v584_v35  ;;  %1256 = vmatpush.bf16.msrb.mxu3 %v584_v35 }
  0xce   : > { %590 = vmatpush.bf16.msra.mxu1 %v583_v38  ;;  %1257 = vmatpush.bf16.msrb.mxu3 %v583_v38 }
  0xd2   : > { %591 = vmatpush.bf16.msra.mxu1 %v582_v44  ;;  %1258 = vmatpush.bf16.msrb.mxu3 %v582_v44 }
  0xd6   : > { %592 = vmatpush.bf16.msra.mxu1 %v581_v48  ;;  %1259 = vmatpush.bf16.msrb.mxu3 %v581_v48 }
  0xda   : > { %593 = vmatpush.bf16.msra.mxu1 %v580_v54  ;;  %1260 = vmatpush.bf16.msrb.mxu3 %v580_v54 }
  0xde   : > { %594 = vmatpush.bf16.msra.mxu1 %v579_v55  ;;  %1261 = vmatpush.bf16.msrb.mxu3 %v579_v55 }
  0xe1   : > { %1146 = vmatmul.msk.bf16.vlgmr.msra.gmra.mxu1 %vm1145_vm4, %v1413_v56  ;;  %1148 = vmatmul.msk.bf16.vlgmr.msrb.gmra.mxu3 %vm1147_vm5, %v1413_v56 }
 0x15e   : > { %v596_v58 = vpop.f32.mrf.mxu1 }
 0x15f   : > { %v605_v59 = vadd.f32 %v596_v58, %v576_v57 }
 0x161   : > { %608 = vst [vmem:[#allocation2 + $0x10] sm:$0xff] %v605_v59 }
 0x164   : > { %v601_v61 = vpop.f32.mrf.mxu3 }
 0x165   : > { %v607_v63 = vadd.f32 %v601_v61, %v578_v60 }
 0x166   : > { %v598_v0 = vpop.f32.mrf.mxu1 }
 0x167   : > { %610 = vst [vmem:[#allocation2 + $0x8] sm:$0xff] %v607_v63  ;;  %v606_v1 = vadd.f32 %v598_v0, %v577_v62 }
 0x168   : > { %614 = sbr.rel (%p1149_p6) target bundleno = 988 (0x3dc), region = 64 }
 0x169   : > { %609 = vst [vmem:[#allocation2] sm:$0xff] %v606_v1 }
 0x16c   : > { %v603_v2 = vpop.f32.mrf.mxu3 }
 0x16d   : > { %v620_v3 = vld [vmem:[%s1631_s4 + $0x10] sm:$0xff]  ;;  %v618_v4 = vld [vmem:[%s1631_s4] sm:$0xff]  ;;  %v1414_v5 = vmov 0   ;;  %v619_v6 = vld [vmem:[%s1631_s4 + $0x8] sm:$0xff] }
 0x16e   : > { %1309 = vset.pattern.permute.xlu1 %v1414_v5  ;;  %1308 = vset.pattern.permute.xlu0 %v1414_v5  ;;  %v1243_v7 = vld [vmem:[%s1632_s5 + $0x38] sm:$0xff]  ;;  %v1242_v8 = vld [vmem:[%s1632_s5 + $0x30] sm:$0xff]  ;;  %v1241_v9 = vld [vmem:[%s1632_s5 + $0x28] sm:$0xff] }
 0x16f   : > { %633 = vperm.xlu1 %1309, %v620_v3   ;;  %623 = vperm.xlu0 %1308, %v618_v4   ;;  %v1240_v10 = vld [vmem:[%s1632_s5 + $0x20] sm:$0xff]  ;;  %v1239_v11 = vld [vmem:[%s1632_s5 + $0x18] sm:$0xff]  ;;  %v1238_v12 = vld [vmem:[%s1632_s5 + $0x10] sm:$0xff] }
 0x170   : > { %1262 = vmatpush.bf16.msra.mxu2 %v1243_v7  ;;  %769 = vmatpush.bf16.msra.mxu0 %v1243_v7  ;;  %v1237_v13 = vld [vmem:[%s1632_s5 + $0x8] sm:$0xff]  ;;  %v615_v15 = vld [vmem:[#allocation2 + $0x10] sm:$0xff]  ;;  %v1236_v16 = vld [vmem:[%s1632_s5] sm:$0xff] }
 0x171   : > { %v617_v14 = vld [vmem:[#allocation2 + $0x8] sm:$0xff]  ;;  %v616_v23 = vld [vmem:[#allocation2] sm:$0xff]  ;;  %v1251_v5 = vld [vmem:[%s1634_s7 + $0x38] sm:$0xff] }
 0x172   : > { %1270 = vmatpush.bf16.msra.mxu3 %v1251_v5  ;;  %917 = vmatpush.bf16.msra.mxu1 %v1251_v5  ;;  %v1249_v7 = vld [vmem:[%s1634_s7 + $0x28] sm:$0xff] }
 0x174   : > { %1263 = vmatpush.bf16.msra.mxu2 %v1242_v8  ;;  %770 = vmatpush.bf16.msra.mxu0 %v1242_v8  ;;  %v1248_v8 = vld [vmem:[%s1634_s7 + $0x20] sm:$0xff] }
 0x177   : > { %628 = vperm.xlu0 %1308, %v619_v6   ;;  %v1250_v6 = vld [vmem:[%s1634_s7 + $0x30] sm:$0xff] }
 0x178   : > { %1264 = vmatpush.bf16.msra.mxu2 %v1241_v9  ;;  %771 = vmatpush.bf16.msra.mxu0 %v1241_v9  ;;  %v1247_v9 = vld [vmem:[%s1634_s7 + $0x18] sm:$0xff] }
 0x179   : > { %1271 = vmatpush.bf16.msra.mxu3 %v1250_v6  ;;  %918 = vmatpush.bf16.msra.mxu1 %v1250_v6 }
 0x17c   : > { %1265 = vmatpush.bf16.msra.mxu2 %v1240_v10  ;;  %772 = vmatpush.bf16.msra.mxu0 %v1240_v10  ;;  %v1246_v10 = vld [vmem:[%s1634_s7 + $0x10] sm:$0xff] }
 0x17d   : > { %1272 = vmatpush.bf16.msra.mxu3 %v1249_v7  ;;  %919 = vmatpush.bf16.msra.mxu1 %v1249_v7 }
 0x180   : > { %1266 = vmatpush.bf16.msra.mxu2 %v1239_v11  ;;  %773 = vmatpush.bf16.msra.mxu0 %v1239_v11  ;;  %v1245_v11 = vld [vmem:[%s1634_s7 + $0x8] sm:$0xff] }
 0x181   : > { %1273 = vmatpush.bf16.msra.mxu3 %v1248_v8  ;;  %920 = vmatpush.bf16.msra.mxu1 %v1248_v8 }
 0x184   : > { %1267 = vmatpush.bf16.msra.mxu2 %v1238_v12  ;;  %774 = vmatpush.bf16.msra.mxu0 %v1238_v12  ;;  %v1310_v12 = vld [vmem:[%s1633_s6] ss:$0 sm:$0xff] }
 0x185   : > { %1274 = vmatpush.bf16.msra.mxu3 %v1247_v9  ;;  %921 = vmatpush.bf16.msra.mxu1 %v1247_v9 }
 0x188   : > { %1268 = vmatpush.bf16.msra.mxu2 %v1237_v13  ;;  %775 = vmatpush.bf16.msra.mxu0 %v1237_v13  ;;  %v1244_v13 = vld [vmem:[%s1634_s7] sm:$0xff] }
 0x189   : > { %1275 = vmatpush.bf16.msra.mxu3 %v1246_v10  ;;  %922 = vmatpush.bf16.msra.mxu1 %v1246_v10 }
 0x18c   : > { %1269 = vmatpush.bf16.msra.mxu2 %v1236_v16  ;;  %776 = vmatpush.bf16.msra.mxu0 %v1236_v16 }
 0x18d   : > { %1276 = vmatpush.bf16.msra.mxu3 %v1245_v11  ;;  %923 = vmatpush.bf16.msra.mxu1 %v1245_v11 }
 0x191   : > { %1277 = vmatpush.bf16.msra.mxu3 %v1244_v13  ;;  %924 = vmatpush.bf16.msra.mxu1 %v1244_v13 }
 0x1e1   : > { %v634_v17 = vpop.permute.xlu1 %633  ;;  %v624_v18 = vpop.permute.xlu0 %623 }
 0x1e2   : > { %v638_v19 = vmul.f32 %v634_v17, %v617_v14  ;;  %v1558_v20 = vmul.f32 %v624_v18, %v615_v15 }
 0x1e4   : > { %v1152_v21 = vmul.f32 -1.442695, %v638_v19  ;;  %v1150_v22 = vmul.f32 -1.442695, %v1558_v20 }
 0x1e6   : > { %1312 = vpow2.f32 %v1152_v21 }
 0x1e7   : > { %1314 = vpow2.f32 %v1150_v22 }
 0x1e9   : > { %v629_v24 = vpop.permute.xlu0 %628 }
 0x1ea   : > { %v637_v25 = vmul.f32 %v629_v24, %v616_v23 }
 0x1ec   : > { %v1313_v26 = vpop.eup %1312  ;;  %v1151_v27 = vmul.f32 -1.442695, %v637_v25 }
 0x1ed   : > { %v1315_v28 = vpop.eup %1314  ;;  %v650_v29 = vadd.f32 1.0, %v1313_v26 }
 0x1ee   : > { %v648_v30 = vadd.f32 1.0, %v1315_v28  ;;  %1316 = vpow2.f32 %v1151_v27 }
 0x1ef   : > { %1318 = vrcp.f32 %v650_v29  ;;  %v690_v39 = vand.u32 2147483647, %v650_v29  ;;  %v692_v40 = vand.u32 2147483648, %v650_v29  ;;  %vm686_vm6 = vweird.f32 %v650_v29 }
 0x1f0   : > { %1320 = vrcp.f32 %v648_v30  ;;  %v662_v50 = vand.u32 2147483648, %v648_v30  ;;  %vm656_vm11 = vweird.f32 %v648_v30  ;;  %v660_v52 = vand.u32 2147483647, %v648_v30 }
 0x1f1   : > { %vm691_vm9 = vcmp.eq.f32.partialorder %v690_v39, 8.507059e+37  ;;  %v693_v46 = vor.u32 1.1754944e-38, %v692_v40 }
 0x1f2   : > { %v663_v60 = vor.u32 1.1754944e-38, %v662_v50  ;;  %vm661_vm14 = vcmp.eq.f32.partialorder %v660_v52, 8.507059e+37 }
 0x1f4   : > { %v1317_v31 = vpop.eup %1316 }
 0x1f5   : > { %v1319_v32 = vpop.eup %1318  ;;  %v649_v33 = vadd.f32 1.0, %v1317_v31 }
 0x1f6   : > { %v1321_v34 = vpop.eup %1320  ;;  %v682_v35 = vmul.f32 %v1319_v32, %v650_v29  ;;  %vm687_vm7 = vweird.f32 %v1319_v32 }
 0x1f7   : > { %v652_v36 = vmul.f32 %v1321_v34, %v648_v30  ;;  %1322 = vrcp.f32 %v649_v33  ;;  %vm688_vm8 = vmor %vm686_vm6, %vm687_vm7  ;;  %vm657_vm10 = vweird.f32 %v1321_v34  ;;  %v675_v55 = vand.u32 2147483647, %v649_v33 }
 0x1f8   : > { %v683_v37 = vsub.f32 1.0, %v682_v35  ;;  %vm658_vm12 = vmor %vm656_vm11, %vm657_vm10  ;;  %v677_v56 = vand.u32 2147483648, %v649_v33  ;;  %vm671_vm15 = vweird.f32 %v649_v33 }
 0x1f9   : > { %v653_v38 = vsub.f32 1.0, %v652_v36  ;;  %vm676_vm1 = vcmp.eq.f32.partialorder %v675_v55, 8.507059e+37 }
 0x1fa   : > { %v684_v41 = vmul.f32 %v1319_v32, %v683_v37  ;;  %v678_v63 = vor.u32 1.1754944e-38, %v677_v56 }
 0x1fb   : > { %v654_v42 = vmul.f32 %v1321_v34, %v653_v38 }
 0x1fc   : > { %v685_v43 = vadd.f32 %v1319_v32, %v684_v41 }
 0x1fd   : > { %v1323_v44 = vpop.eup %1322  ;;  %v655_v47 = vadd.f32 %v1321_v34, %v654_v42 }
 0x1fe   : > { %v667_v48 = vmul.f32 %v1323_v44, %v649_v33  ;;  %v689_v49 = vsel %vm688_vm8, %v1319_v32, %v685_v43  ;;  %vm672_vm13 = vweird.f32 %v1323_v44 }
 0x1ff   : > { %v694_v51 = vsel %vm691_vm9, %v693_v46, %v689_v49  ;;  %v659_v57 = vsel %vm658_vm12, %v1321_v34, %v655_v47  ;;  %vm673_vm0 = vmor %vm671_vm15, %vm672_vm13 }
 0x200   : > { %v668_v53 = vsub.f32 1.0, %v667_v48  ;;  %v698_v54 = vmul.f32 %v694_v51, %v638_v19  ;;  %v664_v62 = vsel %vm661_vm14, %v663_v60, %v659_v57  ;;  %vm970_vm14 = vcmask 7168  }
 0x201   : > { %v696_v2 = vmul.f32 %v664_v62, %v1558_v20 }
 0x202   : > { %v669_v58 = vmul.f32 %v1323_v44, %v668_v53  ;;  %v700_v59 = vpack.c.bf16 %v698_v54, %v698_v54 }
 0x204   : > { %v670_v61 = vadd.f32 %v1323_v44, %v669_v58  ;;  %782 = vmatmul.bf16.vlgmr.msra.gmra.mxu2 %v700_v59 }
 0x206   : > { %v674_v0 = vsel %vm673_vm0, %v1323_v44, %v670_v61  ;;  %vm973_vm0 = vcmp.lt.s32.totalorder %v1514_v45, 2 }
 0x207   : > { %v679_v1 = vsel %vm676_vm1, %v678_v63, %v674_v0 }
 0x208   : > { %v697_v3 = vmul.f32 %v679_v1, %v637_v25 }
 0x20a   : > { %v699_v4 = vpack.c.bf16 %v697_v3, %v696_v2  ;;  %v1311_v2 = vld [vmem:[%s1635_s8] ss:$0 sm:$0xff] }
 0x20c   : > { %777 = vmatmul.bf16.vlgmr.msra.gmra.mxu0 %v699_v4 }
 0x287   : > { %v783_v14 = vpop.f32.mrf.mxu2 }
 0x288   : > { %v784_v15 = vadd.f32 %v1310_v12, %v783_v14 }
 0x289   : > { %v778_v16 = vpop.f32.mrf.mxu0 }
 0x28a   : > { %v1187_v17 = vmul.f32 -1.442695, %v784_v15  ;;  %v1589_v18 = vadd.f32 %v1310_v12, %v778_v16 }
 0x28c   : > { %1324 = vpow2.f32 %v1187_v17  ;;  %v1185_v19 = vmul.f32 -1.442695, %v1589_v18 }
 0x28e   : > { %1326 = vpow2.f32 %v1185_v19 }
 0x28f   : > { %v785_v20 = vpop.f32.mrf.mxu2 }
 0x291   : > { %v780_v21 = vpop.f32.mrf.mxu0 }
 0x292   : > { %v1325_v22 = vpop.eup %1324  ;;  %v781_v23 = vadd.f32 %v1310_v12, %v780_v21 }
 0x293   : > { %v798_v24 = vadd.f32 1.0, %v1325_v22 }
 0x294   : > { %v1327_v25 = vpop.eup %1326  ;;  %v1186_v26 = vmul.f32 -1.442695, %v781_v23 }
 0x295   : > { %1328 = vrcp.f32 %v798_v24  ;;  %v796_v27 = vadd.f32 1.0, %v1327_v25  ;;  %v840_v35 = vand.u32 2147483648, %v798_v24  ;;  %v838_v38 = vand.u32 2147483647, %v798_v24 }
 0x296   : > { %1330 = vpow2.f32 %v1186_v26  ;;  %vm834_vm3 = vweird.f32 %v798_v24 }
 0x297   : > { %1332 = vrcp.f32 %v796_v27  ;;  %v841_v41 = vor.u32 1.1754944e-38, %v840_v35  ;;  %vm839_vm5 = vcmp.eq.f32.partialorder %v838_v38, 8.507059e+37  ;;  %v810_v49 = vand.u32 2147483648, %v796_v27 }
 0x298   : > { %vm804_vm7 = vweird.f32 %v796_v27  ;;  %v808_v50 = vand.u32 2147483647, %v796_v27 }
 0x299   : > { %v811_v57 = vor.u32 1.1754944e-38, %v810_v49 }
 0x29a   : > { %vm809_vm10 = vcmp.eq.f32.partialorder %v808_v50, 8.507059e+37 }
 0x29b   : > { %v1329_v28 = vpop.eup %1328 }
 0x29c   : > { %v1331_v29 = vpop.eup %1330  ;;  %v830_v30 = vmul.f32 %v1329_v28, %v798_v24  ;;  %vm835_vm2 = vweird.f32 %v1329_v28 }
 0x29d   : > { %v1333_v31 = vpop.eup %1332  ;;  %v797_v32 = vadd.f32 1.0, %v1331_v29  ;;  %vm836_vm4 = vmor %vm834_vm3, %vm835_vm2 }
 0x29e   : > { %v800_v33 = vmul.f32 %v1333_v31, %v796_v27  ;;  %v831_v34 = vsub.f32 1.0, %v830_v30  ;;  %vm805_vm6 = vweird.f32 %v1333_v31 }
 0x29f   : > { %1334 = vrcp.f32 %v797_v32  ;;  %vm806_vm8 = vmor %vm804_vm7, %vm805_vm6  ;;  %v825_v53 = vand.u32 2147483648, %v797_v32  ;;  %v823_v56 = vand.u32 2147483647, %v797_v32  ;;  %vm819_vm11 = vweird.f32 %v797_v32 }
 0x2a0   : > { %v801_v36 = vsub.f32 1.0, %v800_v33  ;;  %v832_v37 = vmul.f32 %v1329_v28, %v831_v34 }
 0x2a1   : > { %v826_v60 = vor.u32 1.1754944e-38, %v825_v53  ;;  %vm824_vm13 = vcmp.eq.f32.partialorder %v823_v56, 8.507059e+37 }
 0x2a2   : > { %v802_v39 = vmul.f32 %v1333_v31, %v801_v36  ;;  %v833_v40 = vadd.f32 %v1329_v28, %v832_v37 }
 0x2a4   : > { %v837_v42 = vsel %vm836_vm4, %v1329_v28, %v833_v40  ;;  %v803_v46 = vadd.f32 %v1333_v31, %v802_v39  ;;  %vm994_vm4 = vcmask 0  }
 0x2a5   : > { %v1335_v43 = vpop.eup %1334  ;;  %v842_v44 = vsel %vm839_vm5, %v841_v41, %v837_v42 }
 0x2a6   : > { %v815_v47 = vmul.f32 %v1335_v43, %v797_v32  ;;  %v846_v48 = vmul.f32 %v842_v44, %v784_v15  ;;  %v807_v54 = vsel %vm806_vm8, %v1333_v31, %v803_v46  ;;  %vm820_vm9 = vweird.f32 %v1335_v43 }
 0x2a7   : > { %v812_v59 = vsel %vm809_vm10, %v811_v57, %v807_v54  ;;  %vm821_vm12 = vmor %vm819_vm11, %vm820_vm9  ;;  %v1415_v32 = vmov 0.0  }
 0x2a8   : > { %v816_v51 = vsub.f32 1.0, %v815_v47  ;;  %v848_v52 = vpack.c.bf16 %v846_v48, %v846_v48  ;;  %v844_v63 = vmul.f32 %v812_v59, %v1589_v18  ;;  %v1220_v33 = vsel %vm973_vm0, 1.0, %v1415_v32 }
 0x2aa   : > { %v817_v55 = vmul.f32 %v1335_v43, %v816_v51  ;;  %930 = vmatmul.bf16.vlgmr.msra.gmra.mxu3 %v848_v52 }
 0x2ac   : > { %v818_v58 = vadd.f32 %v1335_v43, %v817_v55 }
 0x2ae   : > { %v822_v61 = vsel %vm821_vm12, %v1335_v43, %v818_v58 }
 0x2af   : > { %v827_v62 = vsel %vm824_vm13, %v826_v60, %v822_v61 }
 0x2b0   : > { %v845_v0 = vmul.f32 %v827_v62, %v781_v23 }
 0x2b2   : > { %v847_v1 = vpack.c.bf16 %v845_v0, %v844_v63 }
 0x2b4   : > { %925 = vmatmul.bf16.vlgmr.msra.gmra.mxu1 %v847_v1 }
 0x32d   : > { %v931_v3 = vpop.f32.mrf.mxu3 }
 0x32e   : > { %v932_v4 = vadd.f32 %v1311_v2, %v931_v3 }
 0x330   : > { %937 = vst [vmem:[#allocation3 + $0x10] sm:$0xff] %v932_v4 }
 0x331   : > { %v926_v5 = vpop.f32.mrf.mxu1 }
 0x332   : > { %v927_v6 = vadd.f32 %v1311_v2, %v926_v5 }
 0x334   : > { %935 = vst [vmem:[#allocation3] sm:$0xff] %v927_v6  ;;  %v939_v7 = vsub.f32 %v927_v6, %v932_v4 }
 0x335   : > { %v933_v8 = vpop.f32.mrf.mxu3 }
 0x336   : > { %v955_v9 = vmul.f32 %v939_v7, %v939_v7 }
 0x338   : > { %956 = vadd.xlane.f32.xlu1 %v955_v9 }
 0x339   : > { %v928_v10 = vpop.f32.mrf.mxu1 }
 0x33a   : > { %v929_v11 = vadd.f32 %v1311_v2, %v928_v10 }
 0x33c   : > { %936 = vst [vmem:[#allocation3 + $0x8] sm:$0xff] %v929_v11  ;;  %v938_v12 = vsub.f32 %v927_v6, %v929_v11 }
 0x33e   : > { %v940_v13 = vmul.f32 %v938_v12, %v938_v12 }
 0x340   : > { %941 = vadd.xlane.f32.xlu2 %v940_v13 }
 0x3ab   : > { %v957_v14 = vpop.xlane.xlu1 %956 }
 0x3ac   : > { %1336 = vrsqrt.f32 %v957_v14  ;;  %vm965_vm15 = vcmp.eq.f32.partialorder %v957_v14, inf  ;;  %v968_v26 = vand.u32 2147483648, %v957_v14  ;;  %vm967_vm1 = vcmp.eq.f32.partialorder %v957_v14, 0.0 }
 0x3b2   : > { %v1337_v15 = vpop.eup %1336 }
 0x3b3   : > { %v959_v16 = vmul.f32 %v1337_v15, %v957_v14  ;;  %v942_v17 = vpop.xlane.xlu2 %941 }
 0x3b4   : > { %1338 = vrsqrt.f32 %v942_v17  ;;  %vm950_vm2 = vcmp.eq.f32.partialorder %v942_v17, inf  ;;  %v953_v38 = vand.u32 2147483648, %v942_v17  ;;  %vm952_vm3 = vcmp.eq.f32.partialorder %v942_v17, 0.0 }
 0x3b5   : > { %v960_v18 = vmul.f32 %v1337_v15, %v959_v16 }
 0x3b7   : > { %v961_v19 = vmul.f32 0.5, %v960_v18 }
 0x3b9   : > { %v962_v20 = vsub.f32 1.5, %v961_v19 }
 0x3ba   : > { %v1339_v21 = vpop.eup %1338 }
 0x3bb   : > { %v963_v22 = vmul.f32 %v1337_v15, %v962_v20  ;;  %v944_v23 = vmul.f32 %v1339_v21, %v942_v17 }
 0x3bd   : > { %v964_v24 = vmul.f32 %v963_v22, %v957_v14  ;;  %v945_v25 = vmul.f32 %v1339_v21, %v944_v23 }
 0x3bf   : > { %v966_v27 = vsel %vm965_vm15, %v957_v14, %v964_v24  ;;  %v946_v28 = vmul.f32 0.5, %v945_v25 }
 0x3c0   : > { %v969_v29 = vsel %vm967_vm1, %v968_v26, %v966_v27 }
 0x3c1   : > { %972 = vst.msk [vmem:[%s1638_s11] sm:$0xff] %vm970_vm14, %v969_v29  ;;  %v976_v30 = vsub.f32 10.0, %v969_v29  ;;  %v947_v31 = vsub.f32 1.5, %v946_v28 }
 0x3c3   : > { %v977_v34 = vmax.f32 %v976_v30, 0.0  ;;  %v948_v35 = vmul.f32 %v1339_v21, %v947_v31 }
 0x3c5   : > { %v985_v36 = vmul.f32 %v1220_v33, %v977_v34  ;;  %v949_v37 = vmul.f32 %v948_v35, %v942_v17 }
 0x3c7   : > { %v986_v45 = vrot.slane %v985_v36, 4  ;;  %v951_v39 = vsel %vm950_vm2, %v942_v17, %v949_v37 }
 0x3c8   : > { %v954_v40 = vsel %vm952_vm3, %v953_v38, %v951_v39 }
 0x3c9   : > { %v987_v41 = vadd.f32 %v986_v45, %v985_v36  ;;  %971 = vst.msk [vmem:[%s1637_s10] sm:$0xff] %vm970_vm14, %v954_v40  ;;  %v978_v42 = vmul.f32 %v1220_v33, %v954_v40 }
 0x3cb   : > { %v988_v43 = vrot.slane %v987_v41, 2  ;;  %v979_v44 = vrot.slane %v978_v42, 4 }
 0x3cd   : > { %v989_v46 = vadd.f32 %v988_v43, %v987_v41  ;;  %v980_v47 = vadd.f32 %v979_v44, %v978_v42 }
 0x3cf   : > { %v981_v48 = vrot.slane %v980_v47, 2  ;;  %v990_v49 = vrot.slane %v989_v46, 1 }
 0x3d1   : > { %v982_v50 = vadd.f32 %v981_v48, %v980_v47  ;;  %v991_v52 = vadd.f32 %v990_v49, %v989_v46 }
 0x3d3   : > { %v983_v51 = vrot.slane %v982_v50, 1 }
 0x3d5   : > { %v984_v53 = vadd.f32 %v983_v51, %v982_v50 }
 0x3d7   : > { %v992_v54 = vadd.f32 %v991_v52, %v984_v53 }
 0x3d9   : > { %v993_v55 = vmul.f32 0.5, %v992_v54 }
 0x3db   : > { %995 = vst.msk [vmem:[#allocation5] sm:$0x1] %vm994_vm4, %v993_v55 }
 0x3dc PF: > { %p1286_p7 = scmp.eq.s32.totalorder %s1491_s22, 2  ;;  %s1416_s18 = smov [#allocation3]  }
 0x3dd   : > { %s1001_s19 = sshll.u32 %s1416_s18, 4  ;;  %s1003_s24 = sshll.u32 %s1636_s9, 4  ;;  %s1002_s19 = int_to_ptr.vmem [resolvable:$true] %s1001_s19  ;;  %s1004_s24 = int_to_ptr.hbm [resolvable:$true] %s1003_s24 }
 0x3de   : > { %s1417_s25 = smov 128   ;;  %s1418_s26 = smov 8  }
 0x3df   : > { %1279 = dma.vmem_to_hbm [thread:$0]  (%p1286_p7), %s1002_s19, 384, %s1004_s24, [#allocation4], %s1417_s25, %s1417_s25, %s1418_s26  }
 0x3e0   : > { %s1024_s29 = sshll.u32 %s1639_s12, 4  ;;  %s1419_s30 = smov [#allocation5]   ;;  %s1025_s29 = int_to_ptr.hbm [resolvable:$true] %s1024_s29 }
 0x3e1   : > { %s1022_s13 = sshll.u32 %s1419_s30, 4  ;;  %s1023_s13 = int_to_ptr.vmem [resolvable:$true] %s1022_s13 }
 0x3e2   : > { %1281 = dma.vmem_to_hbm [thread:$0]  (%p1286_p7), %s1023_s13, 16, %s1025_s29, [#allocation6]  }
 0x3e3   : > { %1401 = dma.done.wait (%p1286_p7), [#allocation4], 384  }
 0x3e4   : > { %1403 = vsyncadd (%p1286_p7), [#allocation4], 4294966912 }
 0x3e5   : > { %1405 = dma.done.wait (%p1286_p7), [#allocation6], 16  }
 0x3e6   : > { %1407 = vsyncadd (%p1286_p7), [#allocation6], 4294967280 }
 0x3e7 PF: > { %s25_s21 = sadd.s32 1, %s1410_s21  }
 0x3e8   : > { %p22_p8 = scmp.ge.s32.totalorder %s25_s21, 5  }
 0x3ea   :  { %24 = sbr.rel (!%p22_p8) target bundleno = 2 (0x2), region = 118 }
 0x3ef   :  { %1049 = vsyncpa [#allocation4], 1 }
 0x3f0   :  { %1051 = vsyncpa [#allocation4 + $0x1], 1 }
 0x3f1   :  { %1052 = vsyncpa [#allocation6], 1 }

</bundles_post_ra>
